<compile_context>
chip_gen: v5e
topology: v5e:2x2
jax: 0.10.0
libtpu: 0.0.40
codegen_flags: <defaults>
</compile_context>

<pallas_src>
import functools

import jax
import jax.numpy as jnp
from jax import lax
from jax.experimental import pallas as pl
from jax.experimental.pallas import tpu as pltpu

D_MODEL = 128
DROPOUT_P = 0.1
EPS = 1e-5


def _round_up(a: int, b: int) -> int:
    return (a + b - 1) // b * b


def _residual_ln_kernel(seed_ref, x_ref, y_ref, gamma_ref, beta_ref, o_ref,
                        *, dropout_p: float, eps: float, block_rows: int):
    # x_ref, y_ref, o_ref: (tm, D) tiles; gamma/beta: (1, D); seed_ref: SMEM (1,)
    y = y_ref[...].astype(jnp.float32)

    if dropout_p > 0.0:
        tm, d = y_ref.shape
        # Stateless counter-based hash of (seed, global_row, col): grid-invariant
        # randomness using only plain integer vector ops (no TPU-only PRNG).
        row0 = jnp.uint32(pl.program_id(0) * block_rows)
        rows = lax.broadcasted_iota(jnp.int32, (tm, d), 0).astype(jnp.uint32) + row0
        cols = lax.broadcasted_iota(jnp.int32, (tm, d), 1).astype(jnp.uint32)
        seed = seed_ref[0].astype(jnp.uint32)
        hsh = seed ^ (rows * jnp.uint32(0x9E3779B1)) ^ (cols * jnp.uint32(0x85EBCA77))
        hsh = hsh ^ (hsh >> 16)
        hsh = hsh * jnp.uint32(0x7FEB352D)
        hsh = hsh ^ (hsh >> 15)
        hsh = hsh * jnp.uint32(0x846CA68B)
        hsh = hsh ^ (hsh >> 16)
        r24 = (hsh >> 8).astype(jnp.int32)                  # uniform in [0, 2^24)
        thresh = jnp.int32(int(round(dropout_p * (1 << 24))))
        keep = r24 >= thresh                                # P(keep) = 1 - p
        y = jnp.where(keep, y * jnp.float32(1.0 / (1.0 - dropout_p)),
                      jnp.float32(0.0))

    h = x_ref[...].astype(jnp.float32) + y

    mean = jnp.mean(h, axis=-1, keepdims=True)
    centered = h - mean
    var = jnp.mean(centered * centered, axis=-1, keepdims=True)  # biased, like torch LN
    inv = lax.rsqrt(var + eps)

    gamma = gamma_ref[...].astype(jnp.float32)
    beta = beta_ref[...].astype(jnp.float32)
    o_ref[...] = (centered * inv * gamma + beta).astype(o_ref.dtype)


def residual_layer(inputs, sublayer, gamma, beta, seed,
                   dropout_p=DROPOUT_P, eps=EPS, tm=1024):
    """inputs: [B, S, D]; sublayer: callable [B,S,D]->[B,S,D] (plain JAX)."""
    B, S, D = inputs.shape
    # TODO(synk): for linear sublayers, fuse the projection onto the MXU inside
    # the kernel to avoid materializing sublayer(x) in HBM; kept generic here.
    y = sublayer(inputs)

    rows = B * S
    x2 = inputs.reshape(rows, D)
    y2 = y.reshape(rows, D)

    # Big row tiles for a bandwidth-bound kernel; pad rows to a tile multiple.
    tm_eff = min(int(tm), _round_up(rows, 8))
    rows_p = _round_up(rows, tm_eff)
    if rows_p != rows:
        pad = rows_p - rows
        x2 = jnp.pad(x2, ((0, pad), (0, 0)))
        y2 = jnp.pad(y2, ((0, pad), (0, 0)))

    kernel = functools.partial(_residual_ln_kernel,
                               dropout_p=float(dropout_p), eps=float(eps),
                               block_rows=tm_eff)

    out = pl.pallas_call(
        kernel,
        out_shape=jax.ShapeDtypeStruct((rows_p, D), inputs.dtype),
        grid_spec=pltpu.PrefetchScalarGridSpec(
            num_scalar_prefetch=1,           # seed lands in SMEM
            grid=(rows_p // tm_eff,),
            in_specs=[
                pl.BlockSpec((tm_eff, D), lambda i, seed_ref: (i, 0)),   # x
                pl.BlockSpec((tm_eff, D), lambda i, seed_ref: (i, 0)),   # sublayer(x)
                pl.BlockSpec((1, D), lambda i, seed_ref: (0, 0)),        # gamma
                pl.BlockSpec((1, D), lambda i, seed_ref: (0, 0)),        # beta
            ],
            out_specs=pl.BlockSpec((tm_eff, D), lambda i, seed_ref: (i, 0)),
        ),
        compiler_params=pltpu.CompilerParams(
            dimension_semantics=("parallel",)),   # element-indexed mask -> safe
    )(jnp.asarray([seed], jnp.int32), x2, y2,
      gamma.reshape(1, D), beta.reshape(1, D))

    return out[:rows].reshape(B, S, D)


if __name__ == "__main__":
    key = jax.random.PRNGKey(0)
    kx, kw, kb = jax.random.split(key, 3)

    B, S, D = 2, 8, D_MODEL
    x = jax.random.normal(kx, (B, S, D), dtype=jnp.float32)

    # nn.LayerNorm default init: gamma=1, beta=0.
    gamma = jnp.ones((D,), jnp.float32)
    beta = jnp.zeros((D,), jnp.float32)

    # Deterministic linear sublayer standing in for the Callable argument.
    w = jax.random.normal(kw, (D, D), dtype=jnp.float32) * (1.0 / jnp.sqrt(D))
    b = jax.random.normal(kb, (D,), dtype=jnp.float32) * 0.01
    sublayer = lambda t: jnp.einsum("bsd,de->bse", t, w) + b

    # Correctness check against a pure-JAX reference with dropout disabled.
    out_nodrop = residual_layer(x, sublayer, gamma, beta, seed=0, dropout_p=0.0)
    h = x + sublayer(x)
    mu = h.mean(-1, keepdims=True)
    var = ((h - mu) ** 2).mean(-1, keepdims=True)
    ref = (h - mu) * lax.rsqrt(var + EPS) * gamma + beta
    assert jnp.allclose(out_nodrop, ref, atol=1e-3, rtol=1e-3), "LayerNorm mismatch"

    # Training-mode path with dropout enabled.
    out = residual_layer(x, sublayer, gamma, beta, seed=1234, dropout_p=DROPOUT_P)
    jax.block_until_ready(out)
    assert out.shape == (B, S, D)
    print("KERNEL_OK")
</pallas_src>

<mosaic_0001>
module attributes {stable_mosaic.version = 11 : i64} {
  func.func @_residual_ln_kernel(%arg0: i32, %arg1: memref<1xi32, #tpu.memory_space<smem>>, %arg2: memref<16x128xf32, #tpu.memory_space<vmem>>, %arg3: memref<16x128xf32, #tpu.memory_space<vmem>>, %arg4: memref<1x128xf32, #tpu.memory_space<vmem>>, %arg5: memref<1x128xf32, #tpu.memory_space<vmem>>, %arg6: memref<16x128xf32, #tpu.memory_space<vmem>>) attributes {dimension_semantics = [#tpu.dimension_semantics<parallel>], iteration_bounds = array<i64: 1>, scalar_prefetch = 1 : i64, scratch_operands = 0 : i64, tpu.core_type = #tpu.core_type<tc>, window_params = [{transform_indices = @transform_0, window_bounds = array<i64: 16, 128>}, {transform_indices = @transform_1, window_bounds = array<i64: 16, 128>}, {pipeline_mode = #tpu.pipeline_mode<synchronous>, transform_indices = @transform_2, window_bounds = array<i64: 1, 128>}, {pipeline_mode = #tpu.pipeline_mode<synchronous>, transform_indices = @transform_3, window_bounds = array<i64: 1, 128>}, {transform_indices = @transform_4, window_bounds = array<i64: 16, 128>}]} {
    %c0 = arith.constant 0 : index
    %c0_0 = arith.constant 0 : index
    %0 = vector.load %arg3[%c0, %c0_0] : memref<16x128xf32, #tpu.memory_space<vmem>>, vector<16x128xf32>
    %c0_1 = arith.constant 0 : index
    %c0_2 = arith.constant 0 : index
    %1 = vector.load %arg2[%c0_1, %c0_2] : memref<16x128xf32, #tpu.memory_space<vmem>>, vector<16x128xf32>
    %2 = arith.addf %1, %0 : vector<16x128xf32>
    %cst = arith.constant dense<0.000000e+00> : vector<16xf32>
    %3 = vector.multi_reduction <add>, %2, %cst [1] : vector<16x128xf32> to vector<16xf32>
    %4 = vector.shape_cast %3 : vector<16xf32> to vector<16x1xf32>
    %cst_3 = arith.constant 1.280000e+02 : f32
    %5 = vector.broadcast %cst_3 : f32 to vector<16x1xf32>
    %6 = arith.divf %4, %5 : vector<16x1xf32>
    %7 = vector.broadcast %6 : vector<16x1xf32> to vector<16x128xf32>
    %8 = arith.subf %2, %7 : vector<16x128xf32>
    %9 = arith.mulf %8, %8 : vector<16x128xf32>
    %cst_4 = arith.constant dense<0.000000e+00> : vector<16xf32>
    %10 = vector.multi_reduction <add>, %9, %cst_4 [1] : vector<16x128xf32> to vector<16xf32>
    %11 = vector.shape_cast %10 : vector<16xf32> to vector<16x1xf32>
    %cst_5 = arith.constant 1.280000e+02 : f32
    %12 = vector.broadcast %cst_5 : f32 to vector<16x1xf32>
    %13 = arith.divf %11, %12 : vector<16x1xf32>
    %cst_6 = arith.constant 9.99999974E-6 : f32
    %14 = vector.broadcast %cst_6 : f32 to vector<16x1xf32>
    %15 = arith.addf %13, %14 : vector<16x1xf32>
    %16 = math.rsqrt %15 : vector<16x1xf32>
    %c0_7 = arith.constant 0 : index
    %c0_8 = arith.constant 0 : index
    %17 = vector.load %arg4[%c0_7, %c0_8] : memref<1x128xf32, #tpu.memory_space<vmem>>, vector<1x128xf32>
    %c0_9 = arith.constant 0 : index
    %c0_10 = arith.constant 0 : index
    %18 = vector.load %arg5[%c0_9, %c0_10] : memref<1x128xf32, #tpu.memory_space<vmem>>, vector<1x128xf32>
    %19 = vector.broadcast %16 : vector<16x1xf32> to vector<16x128xf32>
    %20 = arith.mulf %8, %19 : vector<16x128xf32>
    %21 = vector.broadcast %17 : vector<1x128xf32> to vector<16x128xf32>
    %22 = arith.mulf %20, %21 : vector<16x128xf32>
    %23 = vector.broadcast %18 : vector<1x128xf32> to vector<16x128xf32>
    %24 = arith.addf %22, %23 : vector<16x128xf32>
    %c0_11 = arith.constant 0 : index
    %c0_12 = arith.constant 0 : index
    %25 = vector.load %arg6[%c0_11, %c0_12] : memref<16x128xf32, #tpu.memory_space<vmem>>, vector<16x128xf32>
    tpu.vector_store %arg6[%c0_11, %c0_12], %24 {strides = array<i32>} : memref<16x128xf32, #tpu.memory_space<vmem>>, vector<16x128xf32>,
    return
  }
  func.func @transform_0(%arg0: i32, %arg1: memref<1xi32, #tpu.memory_space<smem>>) -> (i32, i32) {
    %c0_i32 = arith.constant 0 : i32
    %c0_i32_0 = arith.constant 0 : i32
    return %arg0, %c0_i32 : i32, i32
  }
  func.func @transform_1(%arg0: i32, %arg1: memref<1xi32, #tpu.memory_space<smem>>) -> (i32, i32) {
    %c0_i32 = arith.constant 0 : i32
    %c0_i32_0 = arith.constant 0 : i32
    return %arg0, %c0_i32 : i32, i32
  }
  func.func @transform_2(%arg0: i32, %arg1: memref<1xi32, #tpu.memory_space<smem>>) -> (i32, i32) {
    %c0_i32 = arith.constant 0 : i32
    %c0_i32_0 = arith.constant 0 : i32
    %c0_i32_1 = arith.constant 0 : i32
    return %c0_i32, %c0_i32_0 : i32, i32
  }
  func.func @transform_3(%arg0: i32, %arg1: memref<1xi32, #tpu.memory_space<smem>>) -> (i32, i32) {
    %c0_i32 = arith.constant 0 : i32
    %c0_i32_0 = arith.constant 0 : i32
    %c0_i32_1 = arith.constant 0 : i32
    return %c0_i32, %c0_i32_0 : i32, i32
  }
  func.func @transform_4(%arg0: i32, %arg1: memref<1xi32, #tpu.memory_space<smem>>) -> (i32, i32) {
    %c0_i32 = arith.constant 0 : i32
    %c0_i32_0 = arith.constant 0 : i32
    return %arg0, %c0_i32 : i32, i32
  }
}

</mosaic_0001>

<bundles_post_ra>
// kernel: tpu_custom_call.1
= control target key start
LH: loop header
LB: loop body
LE: loop exit
PB: predicated region body
PF: predicated region fallthrough
CT: control target
= control target key end

     0   :  { %11 = vsyncpa [#allocation5], 0  ;;  %s291_s0 = inlined_call_operand.<no memory space> [shape: s32[1], index: 0, kind: input, shape index: {}]   ;;  %s292_s1 = inlined_call_operand.hbm [shape: f32[16,128], index: 1, kind: input, shape index: {}]   ;;  %s293_s2 = inlined_call_operand.hbm [shape: f32[16,128], index: 2, kind: input, shape index: {}]   ;;  %s294_s3 = inlined_call_operand.vmem [shape: f32[1,128], index: 3, kind: input, shape index: {}]   ;;  %s295_s4 = inlined_call_operand.vmem [shape: f32[1,128], index: 4, kind: input, shape index: {}]   ;;  %s296_s5 = inlined_call_operand.hbm [shape: f32[16,128], index: 5, kind: output, shape index: {}]  }
   0x1   :  { %12 = vsyncpa [#allocation8], 0 }
   0x2   :  { %13 = vsyncpa [#allocation6], 0  ;;  %s18_s19 = sshll.u32 %s292_s1, 4  ;;  %s231_s20 = smov [#allocation4]   ;;  %s19_s19 = int_to_ptr.hbm [resolvable:$true] %s18_s19 }
   0x3   :  { %s20_s21 = sshll.u32 %s231_s20, 4  ;;  %s31_s24 = sshll.u32 %s293_s2, 4  ;;  %s21_s21 = int_to_ptr.vmem [resolvable:$true] %s20_s21  ;;  %s32_s24 = int_to_ptr.hbm [resolvable:$true] %s31_s24 }
   0x4   :  { %s232_s25 = smov 128   ;;  %s233_s26 = smov 8  }
   0x5   :  { %26 = dma.hbm_to_vmem [thread:$0]  %s19_s19, 256, %s21_s21, [#allocation5], %s232_s25, %s232_s25, %s233_s26  }
   0x6   :  { %s234_s27 = smov [#allocation7]  }
   0x7   :  { %s33_s28 = sshll.u32 %s234_s27, 4  ;;  %s34_s28 = int_to_ptr.vmem [resolvable:$true] %s33_s28 }
   0x8   :  { %39 = dma.hbm_to_vmem [thread:$0]  %s32_s24, 256, %s34_s28, [#allocation8], %s232_s25, %s232_s25, %s233_s26  }
   0x9   :  { %225 = dma.done.wait [#allocation5], 256  }
   0xa   :  { %226 = vsyncadd [#allocation5], 4294967040 }
   0xb   :  { %227 = dma.done.wait [#allocation8], 256  }
   0xc   :  { %228 = vsyncadd [#allocation8], 4294967040  ;;  %v52_v0 = vld [vmem:[#allocation7] sm:$0xff]  ;;  %v54_v1 = vld [vmem:[#allocation4] sm:$0xff]  ;;  %v235_v6 = vmov 128.0   ;;  %s236_s6 = smov [#allocation9]  }
   0xd   :  { %v56_v2 = vadd.f32 %v54_v1, %v52_v0  ;;  %v53_v3 = vld [vmem:[#allocation7 + $0x8] sm:$0xff]  ;;  %v55_v4 = vld [vmem:[#allocation4 + $0x8] sm:$0xff]  ;;  %147 = vrcp.f32 %v235_v6  ;;  %v145_v35 = vld [vmem:[%s294_s3] ss:$0 sm:$0xff]  ;;  %s123_s3 = sshll.u32 %s236_s6, 4  ;;  %s125_s9 = sshll.u32 %s296_s5, 4  ;;  %s124_s3 = int_to_ptr.vmem [resolvable:$true] %s123_s3  ;;  %s126_s9 = int_to_ptr.hbm [resolvable:$true] %s125_s9 }
   0xe   :  { %v57_v5 = vadd.f32 %v55_v4, %v53_v3  ;;  %v146_v39 = vld [vmem:[%s295_s4] ss:$0 sm:$0xff] }
   0xf   :  { %58 = vadd.xlane.f32.xlu0 %v56_v2 }
  0x13   :  { %v148_v7 = vpop.eup %147 }
  0x14   :  { %v63_v8 = vmul.f32 128.0, %v148_v7  ;;  %vm67_vm0 = vweird.f32 %v148_v7 }
  0x16   :  { %v64_v9 = vsub.f32 1.0, %v63_v8 }
  0x17   :  { %60 = vadd.xlane.f32.xlu0 %v57_v5 }
  0x18   :  { %v65_v10 = vmul.f32 %v148_v7, %v64_v9 }
  0x1a   :  { %v66_v11 = vadd.f32 %v148_v7, %v65_v10 }
  0x1c   :  { %v68_v12 = vsel %vm67_vm0, %v148_v7, %v66_v11 }
  0x82   :  { %v59_v13 = vpop.xlane.xlu0 %58 }
  0x83   :  { %v69_v14 = vmul.f32 %v68_v12, %v59_v13 }
  0x85   :  { %v71_v15 = vsub.f32 %v56_v2, %v69_v14 }
  0x87   :  { %v73_v16 = vmul.f32 %v71_v15, %v71_v15 }
  0x89   :  { %75 = vadd.xlane.f32.xlu1 %v73_v16 }
  0x8a   :  { %v61_v17 = vpop.xlane.xlu0 %60 }
  0x8b   :  { %v70_v18 = vmul.f32 %v68_v12, %v61_v17 }
  0x8d   :  { %v72_v19 = vsub.f32 %v57_v5, %v70_v18 }
  0x8f   :  { %v74_v20 = vmul.f32 %v72_v19, %v72_v19 }
  0x91   :  { %77 = vadd.xlane.f32.xlu1 %v74_v20 }
  0xfc   :  { %v76_v21 = vpop.xlane.xlu1 %75 }
  0xfd   :  { %v79_v22 = vmul.f32 %v76_v21, %v68_v12 }
  0xff   :  { %v81_v23 = vadd.f32 1e-05, %v79_v22 }
 0x101   :  { %149 = vrsqrt.f32 %v81_v23  ;;  %vm89_vm2 = vweird.f32 %v81_v23 }
 0x104   :  { %v78_v24 = vpop.xlane.xlu1 %77 }
 0x105   :  { %v80_v25 = vmul.f32 %v78_v24, %v68_v12 }
 0x107   :  { %v150_v26 = vpop.eup %149  ;;  %v82_v27 = vadd.f32 1e-05, %v80_v25 }
 0x108   :  { %v84_v28 = vmul.f32 %v150_v26, %v81_v23  ;;  %vm90_vm1 = vweird.f32 %v150_v26 }
 0x109   :  { %151 = vrsqrt.f32 %v82_v27  ;;  %vm91_vm3 = vmor %vm89_vm2, %vm90_vm1  ;;  %vm99_vm5 = vweird.f32 %v82_v27 }
 0x10a   :  { %v85_v29 = vmul.f32 %v150_v26, %v84_v28 }
 0x10c   :  { %v86_v30 = vmul.f32 0.5, %v85_v29 }
 0x10e   :  { %v87_v31 = vsub.f32 1.5, %v86_v30 }
 0x10f   :  { %v152_v32 = vpop.eup %151 }
 0x110   :  { %v88_v33 = vmul.f32 %v150_v26, %v87_v31  ;;  %v94_v34 = vmul.f32 %v152_v32, %v82_v27  ;;  %vm100_vm4 = vweird.f32 %v152_v32 }
 0x111   :  { %vm101_vm6 = vmor %vm99_vm5, %vm100_vm4 }
 0x112   :  { %v92_v36 = vsel %vm91_vm3, %v150_v26, %v88_v33  ;;  %v95_v37 = vmul.f32 %v152_v32, %v94_v34 }
 0x113   :  { %v105_v38 = vmul.f32 %v92_v36, %v71_v15 }
 0x114   :  { %v96_v40 = vmul.f32 0.5, %v95_v37 }
 0x115   :  { %v110_v41 = vmul.f32 %v145_v35, %v105_v38 }
 0x116   :  { %v97_v42 = vsub.f32 1.5, %v96_v40 }
 0x117   :  { %v115_v43 = vadd.f32 %v146_v39, %v110_v41 }
 0x118   :  { %v98_v44 = vmul.f32 %v152_v32, %v97_v42 }
 0x119   :  { %117 = vst [vmem:[#allocation9] sm:$0xff] %v115_v43 }
 0x11a   :  { %v102_v45 = vsel %vm101_vm6, %v152_v32, %v98_v44 }
 0x11b   :  { %v106_v46 = vmul.f32 %v102_v45, %v72_v19 }
 0x11d   :  { %v111_v47 = vmul.f32 %v145_v35, %v106_v46 }
 0x11f   :  { %v116_v48 = vadd.f32 %v146_v39, %v111_v47 }
 0x121   :  { %118 = vst [vmem:[#allocation9 + $0x8] sm:$0xff] %v116_v48 }
 0x122   :  { %131 = dma.vmem_to_hbm [thread:$0]  %s124_s3, 256, %s126_s9, [#allocation6], %s232_s25, %s232_s25, %s233_s26  }
 0x123   :  { %229 = dma.done.wait [#allocation6], 256  }
 0x124   :  { %230 = vsyncadd [#allocation6], 4294967040 }
 0x125   :  { %136 = vsyncpa [#allocation5], 1 }
 0x126   :  { %137 = vsyncpa [#allocation8], 1 }
 0x127   :  { %138 = vsyncpa [#allocation6], 1 }

</bundles_post_ra>
